<compile_context>
chip_gen: v6e
topology: v6e:2x2x1
jax: 0.10.0
libtpu: 0.0.40
codegen_flags: <defaults>
</compile_context>

<pallas_src>
import functools

import jax
import jax.numpy as jnp
from jax.experimental import pallas as pl
from jax.experimental.pallas import tpu as pltpu

LN_EPS = 1e-5  # torch.nn.LayerNorm default


def _round_up(x, m):
    return ((x + m - 1) // m) * m


def _compression_kernel(x_ref, w1_ref, w2_ref, bias_ref, out_ref, acc_ref, *,
                        hidden_real, hidden_pad, dout_pad, eps):
    """Grid = (batch_tiles, k_tiles).  acc_ref accumulates x @ W1 over k."""
    k = pl.program_id(1)

    @pl.when(k == 0)
    def _init():
        acc_ref[...] = jnp.zeros_like(acc_ref)

    # --- fmri2embed (partial): accumulate x_tile @ W1_tile on the MXU ---
    acc_ref[...] += jnp.dot(x_ref[...], w1_ref[...],
                            preferred_element_type=jnp.float32)

    @pl.when(k == pl.num_programs(1) - 1)
    def _finalize():
        # h has zeros in the padded lanes (padded W1 cols / b1 entries are 0),
        # so the sum over all lanes equals the sum over the real H lanes.
        h = acc_ref[...] + bias_ref[0:1, :hidden_pad]          # (block_b, H_pad)
        mean = jnp.sum(h, axis=-1, keepdims=True) * (1.0 / hidden_real)
        centered = h - mean
        if hidden_pad != hidden_real:
            lane = jax.lax.broadcasted_iota(jnp.int32, (1, hidden_pad), 1)
            c_for_var = jnp.where(lane < hidden_real, centered, 0.0)
        else:
            c_for_var = centered
        var = jnp.sum(c_for_var * c_for_var, axis=-1, keepdims=True) * (1.0 / hidden_real)
        normed = centered * jax.lax.rsqrt(var + eps)
        # Padded lanes of `normed` are nonzero (-mean * rsqrt), but the
        # corresponding rows of the padded W2' are all zero, so they contribute
        # nothing to the output.
        y = jnp.dot(normed.astype(w2_ref.dtype), w2_ref[...],
                    preferred_element_type=jnp.float32)
        out_ref[...] = (y + bias_ref[1:2, :dout_pad]).astype(out_ref.dtype)


def compression_net_forward(x, w1, b1, gamma, beta, w2, b2, *,
                            block_b=None, block_k=512,
                            compute_dtype=None, eps=LN_EPS):
    """Fused CompressionNet forward.

    x:  (B, input_dim)
    w1: (input_dim, hidden)   (transposed vs. torch.nn.Linear.weight)
    w2: (hidden, output_dim)  (transposed vs. torch.nn.Linear.weight)
    compute_dtype: optionally jnp.bfloat16 on v6e/v7x (accumulation stays f32).
    """
    B, D_in = x.shape
    H = w1.shape[1]
    D_out = w2.shape[1]

    # --- host-side folding: LayerNorm affine + final bias into the 2nd matmul ---
    w2f = (gamma.astype(jnp.float32)[:, None] * w2.astype(jnp.float32))
    b2f = beta.astype(jnp.float32) @ w2.astype(jnp.float32) + b2.astype(jnp.float32)

    # --- lane padding for MXU / lane-dense stores ---
    H_p = _round_up(H, 128)
    D_out_p = _round_up(D_out, 128)
    block_k = min(max(128, _round_up(block_k, 128)), _round_up(D_in, 128))
    D_in_p = _round_up(D_in, block_k)          # multiple of block_k (and of 128)

    # --- batch tiling: large tiles, multiple of 8 sublanes, cap at 256 ---
    if block_b is None:
        block_b = min(_round_up(B, 8), 256)
    block_b = max(8, _round_up(block_b, 8))
    B_p = _round_up(B, block_b)

    cdt = jnp.dtype(x.dtype) if compute_dtype is None else jnp.dtype(compute_dtype)

    x_p = jnp.zeros((B_p, D_in_p), cdt).at[:B, :D_in].set(x.astype(cdt))
    w1_p = jnp.zeros((D_in_p, H_p), cdt).at[:D_in, :H].set(w1.astype(cdt))
    w2_p = jnp.zeros((H_p, D_out_p), cdt).at[:H, :D_out].set(w2f.astype(cdt))

    # Pack b1 and the folded output bias into one (2, P) slab -> single stream.
    P = max(H_p, D_out_p)
    bias_p = jnp.zeros((2, P), jnp.float32)
    bias_p = bias_p.at[0, :H].set(b1.astype(jnp.float32))
    bias_p = bias_p.at[1, :D_out].set(b2f)

    grid = (B_p // block_b, D_in_p // block_k)

    kernel = functools.partial(
        _compression_kernel,
        hidden_real=H, hidden_pad=H_p, dout_pad=D_out_p, eps=eps)

    out = pl.pallas_call(
        kernel,
        out_shape=jax.ShapeDtypeStruct((B_p, D_out_p), jnp.float32),
        grid_spec=pltpu.PrefetchScalarGridSpec(
            num_scalar_prefetch=0,
            grid=grid,
            in_specs=[
                pl.BlockSpec((block_b, block_k), lambda i, k: (i, k)),  # x tile
                pl.BlockSpec((block_k, H_p), lambda i, k: (k, 0)),      # W1 K-tile
                pl.BlockSpec((H_p, D_out_p), lambda i, k: (0, 0)),      # W2' (resident)
                pl.BlockSpec((2, P), lambda i, k: (0, 0)),              # [b1; b2'] slab
            ],
            out_specs=pl.BlockSpec((block_b, D_out_p), lambda i, k: (i, 0)),
            scratch_shapes=[pltpu.VMEM((block_b, H_p), jnp.float32)],   # x@W1 accumulator
        ),
        compiler_params=pltpu.CompilerParams(
            dimension_semantics=("parallel", "arbitrary")),
    )(x_p, w1_p, w2_p, bias_p)

    return out[:B, :D_out].astype(x.dtype)


def reference_forward(x, w1, b1, gamma, beta, w2, b2):
    h = x @ w1 + b1
    mean = jnp.mean(h, axis=-1, keepdims=True)
    var = jnp.mean((h - mean) ** 2, axis=-1, keepdims=True)
    hn = (h - mean) / jnp.sqrt(var + LN_EPS)
    hn = hn * gamma + beta
    return hn @ w2 + b2


if __name__ == "__main__":
    # Small shapes consistent with the module's forward:
    # x: (batch, input_dim) = (16, 32), hidden_dim = 32, output_dim = 24
    batch, input_dim, hidden_dim, output_dim = 16, 32, 32, 24

    key = jax.random.PRNGKey(0)
    kx, k1, kb1, kg, kbeta, k2, kb2 = jax.random.split(key, 7)

    x = jax.random.normal(kx, (batch, input_dim), dtype=jnp.float32)

    # Deterministic parameter init (uniform, matching torch.nn.Linear bounds).
    bound1 = 1.0 / jnp.sqrt(input_dim)
    w1 = jax.random.uniform(k1, (input_dim, hidden_dim), jnp.float32, -bound1, bound1)
    b1 = jax.random.uniform(kb1, (hidden_dim,), jnp.float32, -bound1, bound1)

    # Non-trivial LayerNorm affine so the host-side folding path is exercised.
    gamma = 1.0 + 0.1 * jax.random.normal(kg, (hidden_dim,), jnp.float32)
    beta = 0.1 * jax.random.normal(kbeta, (hidden_dim,), jnp.float32)

    bound2 = 1.0 / jnp.sqrt(hidden_dim)
    w2 = jax.random.uniform(k2, (hidden_dim, output_dim), jnp.float32, -bound2, bound2)
    b2 = jax.random.uniform(kb2, (output_dim,), jnp.float32, -bound2, bound2)

    out = compression_net_forward(x, w1, b1, gamma, beta, w2, b2)
    out = jax.block_until_ready(out)

    ref = reference_forward(x, w1, b1, gamma, beta, w2, b2)
    assert out.shape == (batch, output_dim)
    assert jnp.allclose(out, ref, atol=2e-5, rtol=2e-5), "mismatch vs reference"

    print("KERNEL_OK")
</pallas_src>

<mosaic_0001>
module attributes {stable_mosaic.version = 11 : i64} {
  func.func @_compression_kernel(%arg0: i32, %arg1: i32, %arg2: memref<16x128xf32, #tpu.memory_space<vmem>>, %arg3: memref<128x128xf32, #tpu.memory_space<vmem>>, %arg4: memref<128x128xf32, #tpu.memory_space<vmem>>, %arg5: memref<2x128xf32, #tpu.memory_space<vmem>>, %arg6: memref<16x128xf32, #tpu.memory_space<vmem>>, %arg7: memref<16x128xf32, #tpu.memory_space<vmem>>) attributes {dimension_semantics = [#tpu.dimension_semantics<parallel>, #tpu.dimension_semantics<arbitrary>], iteration_bounds = array<i64: 1, 1>, scalar_prefetch = 0 : i64, scratch_operands = 1 : i64, tpu.core_type = #tpu.core_type<tc>, window_params = [{transform_indices = @transform_0, window_bounds = array<i64: 16, 128>}, {transform_indices = @transform_1, window_bounds = array<i64: 128, 128>}, {pipeline_mode = #tpu.pipeline_mode<synchronous>, transform_indices = @transform_2, window_bounds = array<i64: 128, 128>}, {pipeline_mode = #tpu.pipeline_mode<synchronous>, transform_indices = @transform_3, window_bounds = array<i64: 2, 128>}, {transform_indices = @transform_4, window_bounds = array<i64: 16, 128>}]} {
    %c0_i32 = arith.constant 0 : i32
    %0 = arith.cmpi eq, %arg1, %c0_i32 : i32
    %1 = arith.extui %0 : i1 to i32
    %c0_i32_0 = arith.constant 0 : i32
    %2 = arith.cmpi ne, %1, %c0_i32_0 : i32
    scf.if %2 {
      %cst_10 = arith.constant 0.000000e+00 : f32
      %12 = vector.broadcast %cst_10 : f32 to vector<16x128xf32>
      %c0_11 = arith.constant 0 : index
      %c0_12 = arith.constant 0 : index
      %13 = vector.load %arg7[%c0_11, %c0_12] : memref<16x128xf32, #tpu.memory_space<vmem>>, vector<16x128xf32>
      tpu.vector_store %arg7[%c0_11, %c0_12], %12 {strides = array<i32>} : memref<16x128xf32, #tpu.memory_space<vmem>>, vector<16x128xf32>,
    } else {
    }
    %c0 = arith.constant 0 : index
    %c0_1 = arith.constant 0 : index
    %3 = vector.load %arg7[%c0, %c0_1] : memref<16x128xf32, #tpu.memory_space<vmem>>, vector<16x128xf32>
    %c0_2 = arith.constant 0 : index
    %c0_3 = arith.constant 0 : index
    %4 = vector.load %arg2[%c0_2, %c0_3] : memref<16x128xf32, #tpu.memory_space<vmem>>, vector<16x128xf32>
    %c0_4 = arith.constant 0 : index
    %c0_5 = arith.constant 0 : index
    %5 = vector.load %arg3[%c0_4, %c0_5] : memref<128x128xf32, #tpu.memory_space<vmem>>, vector<128x128xf32>
    %cst = arith.constant dense<0.000000e+00> : vector<16x128xf32>
    %6 = tpu.matmul %4, %5, %cst {dimension_numbers = #tpu.dot_dimension_numbers<[1], [0], [0], [1], [0, 0, 1, 1], [], []>} : vector<16x128xf32>, vector<128x128xf32>, vector<16x128xf32> -> vector<16x128xf32>
    %7 = arith.addf %3, %6 : vector<16x128xf32>
    %c0_6 = arith.constant 0 : index
    %c0_7 = arith.constant 0 : index
    %8 = vector.load %arg7[%c0_6, %c0_7] : memref<16x128xf32, #tpu.memory_space<vmem>>, vector<16x128xf32>
    tpu.vector_store %arg7[%c0_6, %c0_7], %7 {strides = array<i32>} : memref<16x128xf32, #tpu.memory_space<vmem>>, vector<16x128xf32>,
    %c0_i32_8 = arith.constant 0 : i32
    %9 = arith.cmpi eq, %arg1, %c0_i32_8 : i32
    %10 = arith.extui %9 : i1 to i32
    %c0_i32_9 = arith.constant 0 : i32
    %11 = arith.cmpi ne, %10, %c0_i32_9 : i32
    scf.if %11 {
      %c0_10 = arith.constant 0 : index
      %c0_11 = arith.constant 0 : index
      %12 = vector.load %arg7[%c0_10, %c0_11] : memref<16x128xf32, #tpu.memory_space<vmem>>, vector<16x128xf32>
      %c0_12 = arith.constant 0 : index
      %c0_13 = arith.constant 0 : index
      %13 = vector.load %arg5[%c0_12, %c0_13] : memref<2x128xf32, #tpu.memory_space<vmem>>, vector<1x128xf32>
      %14 = vector.broadcast %13 : vector<1x128xf32> to vector<16x128xf32>
      %15 = arith.addf %12, %14 : vector<16x128xf32>
      %cst_14 = arith.constant dense<0.000000e+00> : vector<16xf32>
      %16 = vector.multi_reduction <add>, %15, %cst_14 [1] : vector<16x128xf32> to vector<16xf32>
      %17 = vector.shape_cast %16 : vector<16xf32> to vector<16x1xf32>
      %cst_15 = arith.constant 3.125000e-02 : f32
      %18 = vector.broadcast %cst_15 : f32 to vector<16x1xf32>
      %19 = arith.mulf %17, %18 : vector<16x1xf32>
      %20 = vector.broadcast %19 : vector<16x1xf32> to vector<16x128xf32>
      %21 = arith.subf %15, %20 : vector<16x128xf32>
      %22 = tpu.iota {dimensions = array<i32: 1>} : vector<1x128xi32>
      %c32_i32 = arith.constant 32 : i32
      %23 = vector.broadcast %c32_i32 : i32 to vector<1x128xi32>
      %24 = arith.cmpi slt, %22, %23 : vector<1x128xi32>
      %cst_16 = arith.constant 0.000000e+00 : f32
      %25 = vector.shape_cast %24 : vector<1x128xi1> to vector<1x128xi1>
      %26 = vector.broadcast %25 : vector<1x128xi1> to vector<16x128xi1>
      %27 = vector.broadcast %cst_16 : f32 to vector<16x128xf32>
      %28 = arith.select %26, %21, %27 : vector<16x128xi1>, vector<16x128xf32>
      %29 = arith.mulf %28, %28 : vector<16x128xf32>
      %cst_17 = arith.constant dense<0.000000e+00> : vector<16xf32>
      %30 = vector.multi_reduction <add>, %29, %cst_17 [1] : vector<16x128xf32> to vector<16xf32>
      %31 = vector.shape_cast %30 : vector<16xf32> to vector<16x1xf32>
      %cst_18 = arith.constant 3.125000e-02 : f32
      %32 = vector.broadcast %cst_18 : f32 to vector<16x1xf32>
      %33 = arith.mulf %31, %32 : vector<16x1xf32>
      %cst_19 = arith.constant 9.99999974E-6 : f32
      %34 = vector.broadcast %cst_19 : f32 to vector<16x1xf32>
      %35 = arith.addf %33, %34 : vector<16x1xf32>
      %36 = math.rsqrt %35 : vector<16x1xf32>
      %37 = vector.broadcast %36 : vector<16x1xf32> to vector<16x128xf32>
      %38 = arith.mulf %21, %37 : vector<16x128xf32>
      %c0_20 = arith.constant 0 : index
      %c0_21 = arith.constant 0 : index
      %39 = vector.load %arg4[%c0_20, %c0_21] : memref<128x128xf32, #tpu.memory_space<vmem>>, vector<128x128xf32>
      %cst_22 = arith.constant dense<0.000000e+00> : vector<16x128xf32>
      %40 = tpu.matmul %38, %39, %cst_22 {dimension_numbers = #tpu.dot_dimension_numbers<[1], [0], [0], [1], [0, 0, 1, 1], [], []>} : vector<16x128xf32>, vector<128x128xf32>, vector<16x128xf32> -> vector<16x128xf32>
      %c1 = arith.constant 1 : index
      %c0_23 = arith.constant 0 : index
      %41 = vector.load %arg5[%c1, %c0_23] : memref<2x128xf32, #tpu.memory_space<vmem>>, vector<1x128xf32>
      %42 = vector.broadcast %41 : vector<1x128xf32> to vector<16x128xf32>
      %43 = arith.addf %40, %42 : vector<16x128xf32>
      %c0_24 = arith.constant 0 : index
      %c0_25 = arith.constant 0 : index
      %44 = vector.load %arg6[%c0_24, %c0_25] : memref<16x128xf32, #tpu.memory_space<vmem>>, vector<16x128xf32>
      tpu.vector_store %arg6[%c0_24, %c0_25], %43 {strides = array<i32>} : memref<16x128xf32, #tpu.memory_space<vmem>>, vector<16x128xf32>,
    } else {
    }
    return
  }
  func.func @transform_0(%arg0: i32, %arg1: i32) -> (i32, i32) {
    %c0_i32 = arith.constant 0 : i32
    return %arg0, %arg1 : i32, i32
  }
  func.func @transform_1(%arg0: i32, %arg1: i32) -> (i32, i32) {
    %c0_i32 = arith.constant 0 : i32
    %c0_i32_0 = arith.constant 0 : i32
    return %arg1, %c0_i32 : i32, i32
  }
  func.func @transform_2(%arg0: i32, %arg1: i32) -> (i32, i32) {
    %c0_i32 = arith.constant 0 : i32
    %c0_i32_0 = arith.constant 0 : i32
    %c0_i32_1 = arith.constant 0 : i32
    return %c0_i32, %c0_i32_0 : i32, i32
  }
  func.func @transform_3(%arg0: i32, %arg1: i32) -> (i32, i32) {
    %c0_i32 = arith.constant 0 : i32
    %c0_i32_0 = arith.constant 0 : i32
    %c0_i32_1 = arith.constant 0 : i32
    return %c0_i32, %c0_i32_0 : i32, i32
  }
  func.func @transform_4(%arg0: i32, %arg1: i32) -> (i32, i32) {
    %c0_i32 = arith.constant 0 : i32
    %c0_i32_0 = arith.constant 0 : i32
    return %arg0, %c0_i32 : i32, i32
  }
}

</mosaic_0001>

<bundles_post_ra>
// kernel: tpu_custom_call.1
= control target key start
LH: loop header
LB: loop body
LE: loop exit
PB: predicated region body
PF: predicated region fallthrough
CT: control target
= control target key end

     0   :  { %9 = vsyncpa [#allocation4], 0  ;;  %s586_s0 = inlined_call_operand.hbm [shape: f32[16,128], index: 0, kind: input, shape index: {}]   ;;  %s587_s1 = inlined_call_operand.hbm [shape: f32[128,128], index: 1, kind: input, shape index: {}]   ;;  %s588_s2 = inlined_call_operand.hbm [shape: f32[128,128], index: 2, kind: input, shape index: {}]   ;;  %s589_s3 = inlined_call_operand.vmem [shape: f32[2,128], index: 3, kind: input, shape index: {}]   ;;  %s590_s4 = inlined_call_operand.hbm [shape: f32[16,128], index: 4, kind: output, shape index: {}]  }
   0x1   :  { %10 = vsyncpa [#allocation7], 0 }
   0x2   :  { %11 = vsyncpa [#allocation5], 0  ;;  %s525_s15 = smov [#allocation6]   ;;  %s526_s17 = smov [#allocation3]  }
   0x3   :  { %s29_s16 = sshll.u32 %s525_s15, 4  ;;  %s17_s18 = sshll.u32 %s526_s17, 4  ;;  %s30_s16 = int_to_ptr.vmem [resolvable:$true] %s29_s16  ;;  %s18_s18 = int_to_ptr.vmem [resolvable:$true] %s17_s18 }
   0x4   :  { %s447_s19 = scalar_lea.vmem %s30_s16, 2048  ;;  %p452_p1 = scmp.lt.s32.totalorder %s30_s16, %s30_s16 }
   0x5   :  { %p448_p0 = scmp.ne.s32.totalorder %s30_s16, %s447_s19  ;;  %p453_p2 = scmp.lt.s32.totalorder %s447_s19, %s447_s19 }
   0x7   :  { %p454_p3 = por %p453_p2, %p452_p1 }
   0x9   :  { %p455_p4 = pnand %p454_p3, %p448_p0 }
   0xb   :  { %458 = shalt.err (!%p455_p4)
}
   0xc   :  { %s527_s20 = smov 128   ;;  %s528_s21 = smov 8  }
   0xd   :  { %35 = dma.hbm_to_vmem [thread:$0]  %s587_s1, 2048, %s30_s16, [#allocation7], %s527_s20, %s527_s20, %s528_s21  }
   0xe   :  { %s467_s24 = scalar_lea.vmem %s18_s18, 256  ;;  %p472_p6 = scmp.lt.s32.totalorder %s18_s18, %s18_s18 }
   0xf   :  { %p468_p5 = scmp.ne.s32.totalorder %s18_s18, %s467_s24  ;;  %p473_p7 = scmp.lt.s32.totalorder %s467_s24, %s467_s24 }
  0x11   :  { %p474_p8 = por %p473_p7, %p472_p6 }
  0x13   :  { %p475_p9 = pnand %p474_p8, %p468_p5 }
  0x15   :  { %478 = shalt.err (!%p475_p9)
}
  0x16   :  { %23 = dma.hbm_to_vmem [thread:$0]  %s586_s0, 256, %s18_s18, [#allocation4], %s527_s20, %s527_s20, %s528_s21  }
  0x17   :  { %s529_s27 = smov [#allocation8]  }
  0x18   :  { %s41_s28 = sshll.u32 %s529_s27, 4  ;;  %s42_s28 = int_to_ptr.vmem [resolvable:$true] %s41_s28 }
  0x19   :  { %s487_s29 = scalar_lea.vmem %s42_s28, 2048  ;;  %p492_p11 = scmp.lt.s32.totalorder %s42_s28, %s42_s28 }
  0x1a   :  { %p488_p10 = scmp.ne.s32.totalorder %s42_s28, %s487_s29  ;;  %p493_p12 = scmp.lt.s32.totalorder %s487_s29, %s487_s29 }
  0x1c   :  { %p494_p13 = por %p493_p12, %p492_p11 }
  0x1e   :  { %p495_p0 = pnand %p494_p13, %p488_p10 }
  0x20   :  { %498 = shalt.err (!%p495_p0)
}
  0x21   :  { %47 = dma.hbm_to_vmem [thread:$0]  %s588_s2, 2048, %s42_s28, [#allocation7], %s527_s20, %s527_s20, %s528_s21  }
  0x22   :  { %519 = dma.done.wait [#allocation4], 256  }
  0x23   :  { %520 = vsyncadd [#allocation4], 4294967040 }
  0x24   :  { %521 = dma.done.wait [#allocation7], 4096  }
  0x25   :  { %522 = vsyncadd [#allocation7], 4294963200  ;;  %v84_v0 = vld [vmem:[#allocation6 + $0x78] sm:$0xff]  ;;  %v83_v1 = vld [vmem:[#allocation6 + $0x70] sm:$0xff]  ;;  %v184_v27 = vlaneseq  ;;  %s530_s7 = smov [#allocation9]  }
  0x26   :  { %359 = vmatprep.subr.mxu0 %v84_v0  ;;  %v82_v2 = vld [vmem:[#allocation6 + $0x68] sm:$0xff]  ;;  %v81_v3 = vld [vmem:[#allocation6 + $0x60] sm:$0xff]  ;;  %v67_v4 = vld [vmem:[#allocation3] sm:$0xff]  ;;  %s308_s8 = sshll.u32 %s530_s7, 4  ;;  %s309_s8 = int_to_ptr.vmem [resolvable:$true] %s308_s8 }
  0x27   :  { %360 = vmatpush3.msra.mxu0 %v84_v0  ;;  %v80_v5 = vld [vmem:[#allocation6 + $0x58] sm:$0xff]  ;;  %391 = vmatprep.mubr.f32.mxu0 %v67_v4  ;;  %v79_v6 = vld [vmem:[#allocation6 + $0x50] sm:$0xff]  ;;  %v78_v7 = vld [vmem:[#allocation6 + $0x48] sm:$0xff]  ;;  %v185_v28 = vand.u32 127, %v184_v27  ;;  %s499_s9 = scalar_lea.vmem %s309_s8, 256  ;;  %p504_p2 = scmp.lt.s32.totalorder %s309_s8, %s309_s8 }
  0x28   :  { %361 = vmatprep.subr.mxu0 %v83_v1  ;;  %v77_v8 = vld [vmem:[#allocation6 + $0x40] sm:$0xff]  ;;  %v76_v9 = vld [vmem:[#allocation6 + $0x38] sm:$0xff]  ;;  %v75_v10 = vld [vmem:[#allocation6 + $0x30] sm:$0xff]  ;;  %p500_p1 = scmp.ne.s32.totalorder %s309_s8, %s499_s9  ;;  %p505_p3 = scmp.lt.s32.totalorder %s499_s9, %s499_s9 }
  0x29   :  { %362 = vmatpush3.msra.mxu0 %v83_v1  ;;  %v74_v11 = vld [vmem:[#allocation6 + $0x28] sm:$0xff]  ;;  %v73_v12 = vld [vmem:[#allocation6 + $0x20] sm:$0xff]  ;;  %v72_v13 = vld [vmem:[#allocation6 + $0x18] sm:$0xff]  ;;  %vm186_vm0 = vcmp.lt.s32.totalorder %v185_v28, 32 }
  0x2a   :  { %363 = vmatprep.subr.mxu0 %v82_v2  ;;  %v71_v14 = vld [vmem:[#allocation6 + $0x10] sm:$0xff]  ;;  %v70_v15 = vld [vmem:[#allocation6 + $0x8] sm:$0xff]  ;;  %v69_v16 = vld [vmem:[#allocation6] sm:$0xff]  ;;  %p506_p4 = por %p505_p3, %p504_p2 }
  0x2b   :  { %364 = vmatpush3.msra.mxu0 %v82_v2  ;;  %v68_v17 = vld [vmem:[#allocation3 + $0x8] sm:$0xff]  ;;  %v321_v19 = vld [vmem:[%s589_s3] ss:$0 sm:$0xff]  ;;  %v218_v25 = vld [vmem:[#allocation8 + $0x68] sm:$0xff] }
  0x2c   :  { %365 = vmatprep.subr.mxu0 %v81_v3  ;;  %v220_v23 = vld [vmem:[#allocation8 + $0x78] sm:$0xff]  ;;  %v219_v24 = vld [vmem:[#allocation8 + $0x70] sm:$0xff]  ;;  %v217_v26 = vld [vmem:[#allocation8 + $0x60] sm:$0xff]  ;;  %p507_p5 = pnand %p506_p4, %p500_p1 }
  0x2d   :  { %366 = vmatpush3.msra.mxu0 %v81_v3  ;;  %394 = vmatprep.subr.mxu1 %v220_v23  ;;  %v216_v39 = vld [vmem:[#allocation8 + $0x58] sm:$0xff]  ;;  %v215_v40 = vld [vmem:[#allocation8 + $0x50] sm:$0xff]  ;;  %v214_v41 = vld [vmem:[#allocation8 + $0x48] sm:$0xff] }
  0x2e   :  { %367 = vmatprep.subr.mxu0 %v80_v5  ;;  %395 = vmatpush3.msra.mxu1 %v220_v23  ;;  %v213_v42 = vld [vmem:[#allocation8 + $0x40] sm:$0xff]  ;;  %v212_v43 = vld [vmem:[#allocation8 + $0x38] sm:$0xff]  ;;  %v211_v44 = vld [vmem:[#allocation8 + $0x30] sm:$0xff] }
  0x2f   :  { %368 = vmatpush3.msra.mxu0 %v80_v5  ;;  %396 = vmatprep.subr.mxu1 %v219_v24  ;;  %v210_v45 = vld [vmem:[#allocation8 + $0x28] sm:$0xff]  ;;  %v209_v46 = vld [vmem:[#allocation8 + $0x20] sm:$0xff]  ;;  %v208_v47 = vld [vmem:[#allocation8 + $0x18] sm:$0xff] }
  0x30   :  { %369 = vmatprep.subr.mxu0 %v79_v6  ;;  %397 = vmatpush3.msra.mxu1 %v219_v24  ;;  %v207_v48 = vld [vmem:[#allocation8 + $0x10] sm:$0xff]  ;;  %v206_v49 = vld [vmem:[#allocation8 + $0x8] sm:$0xff]  ;;  %v205_v50 = vld [vmem:[#allocation8] sm:$0xff] }
  0x31   :  { %370 = vmatpush3.msra.mxu0 %v79_v6  ;;  %398 = vmatprep.subr.mxu1 %v218_v25  ;;  %v322_v61 = vld [vmem:[%s589_s3 + $0x1] ss:$0 sm:$0xff] }
  0x32   :  { %371 = vmatprep.subr.mxu0 %v78_v7  ;;  %399 = vmatpush3.msra.mxu1 %v218_v25 }
  0x33   :  { %372 = vmatpush3.msra.mxu0 %v78_v7  ;;  %400 = vmatprep.subr.mxu1 %v217_v26 }
  0x34   :  { %373 = vmatprep.subr.mxu0 %v77_v8  ;;  %401 = vmatpush3.msra.mxu1 %v217_v26 }
  0x35   :  { %374 = vmatpush3.msra.mxu0 %v77_v8  ;;  %402 = vmatprep.subr.mxu1 %v216_v39 }
  0x36   :  { %375 = vmatprep.subr.mxu0 %v76_v9  ;;  %403 = vmatpush3.msra.mxu1 %v216_v39 }
  0x37   :  { %376 = vmatpush3.msra.mxu0 %v76_v9  ;;  %404 = vmatprep.subr.mxu1 %v215_v40 }
  0x38   :  { %377 = vmatprep.subr.mxu0 %v75_v10  ;;  %405 = vmatpush3.msra.mxu1 %v215_v40 }
  0x39   :  { %378 = vmatpush3.msra.mxu0 %v75_v10  ;;  %406 = vmatprep.subr.mxu1 %v214_v41 }
  0x3a   :  { %379 = vmatprep.subr.mxu0 %v74_v11  ;;  %407 = vmatpush3.msra.mxu1 %v214_v41 }
  0x3b   :  { %380 = vmatpush3.msra.mxu0 %v74_v11  ;;  %408 = vmatprep.subr.mxu1 %v213_v42 }
  0x3c   :  { %381 = vmatprep.subr.mxu0 %v73_v12  ;;  %409 = vmatpush3.msra.mxu1 %v213_v42 }
  0x3d   :  { %382 = vmatpush3.msra.mxu0 %v73_v12  ;;  %410 = vmatprep.subr.mxu1 %v212_v43 }
  0x3e   :  { %383 = vmatprep.subr.mxu0 %v72_v13  ;;  %411 = vmatpush3.msra.mxu1 %v212_v43 }
  0x3f   :  { %384 = vmatpush3.msra.mxu0 %v72_v13  ;;  %412 = vmatprep.subr.mxu1 %v211_v44 }
  0x40   :  { %385 = vmatprep.subr.mxu0 %v71_v14  ;;  %413 = vmatpush3.msra.mxu1 %v211_v44 }
  0x41   :  { %386 = vmatpush3.msra.mxu0 %v71_v14  ;;  %414 = vmatprep.subr.mxu1 %v210_v45 }
  0x42   :  { %387 = vmatprep.subr.mxu0 %v70_v15  ;;  %415 = vmatpush3.msra.mxu1 %v210_v45 }
  0x43   :  { %388 = vmatpush3.msra.mxu0 %v70_v15  ;;  %416 = vmatprep.subr.mxu1 %v209_v46 }
  0x44   :  { %389 = vmatprep.subr.mxu0 %v69_v16  ;;  %417 = vmatpush3.msra.mxu1 %v209_v46 }
  0x45   :  { %390 = vmatpush3.msra.mxu0 %v69_v16  ;;  %418 = vmatprep.subr.mxu1 %v208_v47 }
  0x46   :  { %392 = vmatmul.mubr.f32.vlgmr.msra.gmra.mxu0 %v68_v17  ;;  %419 = vmatpush3.msra.mxu1 %v208_v47 }
  0x47   :  { %420 = vmatprep.subr.mxu1 %v207_v48 }
  0x48   :  { %421 = vmatpush3.msra.mxu1 %v207_v48 }
  0x49   :  { %422 = vmatprep.subr.mxu1 %v206_v49 }
  0x4a   :  { %423 = vmatpush3.msra.mxu1 %v206_v49 }
  0x4b   :  { %424 = vmatprep.subr.mxu1 %v205_v50 }
  0x4c   :  { %425 = vmatpush3.msra.mxu1 %v205_v50 }
 0x106   :  { %v393_v18 = vpop.f32.mrf.mxu0 }
 0x107   :  { %v175_v22 = vadd.f32 %v393_v18, %v321_v19 }
 0x108   :  { %v151_v20 = vpop.f32.mrf.mxu0 }
 0x109   :  { %v174_v21 = vadd.f32 %v321_v19, %v151_v20 }
 0x10b   :  { %176 = vadd.xlane.f32.xlu0 %v174_v21 }
 0x10f   :  { %178 = vadd.xlane.f32.xlu0 %v175_v22 }
 0x194   :  { %v177_v29 = vpop.xlane.xlu0 %176 }
 0x195   :  { %v180_v30 = vmul.f32 0.03125, %v177_v29 }
 0x197   :  { %v182_v31 = vsub.f32 %v174_v21, %v180_v30 }
 0x198   :  { %v179_v32 = vpop.xlane.xlu0 %178 }
 0x199   :  { %v181_v33 = vmul.f32 0.03125, %v179_v32  ;;  %v189_v34 = vsel %vm186_vm0, %v182_v31, 0.0 }
 0x19a   :  { %v191_v35 = vmul.f32 %v189_v34, %v189_v34 }
 0x19b   :  { %v183_v36 = vsub.f32 %v175_v22, %v181_v33 }
 0x19c   :  { %193 = vadd.xlane.f32.xlu1 %v191_v35 }
 0x19d   :  { %v190_v37 = vsel %vm186_vm0, %v183_v36, 0.0 }
 0x19e   :  { %v192_v38 = vmul.f32 %v190_v37, %v190_v37 }
 0x1a0   :  { %195 = vadd.xlane.f32.xlu1 %v192_v38 }
 0x225   :  { %v194_v51 = vpop.xlane.xlu1 %193 }
 0x226   :  { %v197_v52 = vmul.f32 0.03125, %v194_v51 }
 0x228   :  { %v199_v53 = vadd.f32 1e-05, %v197_v52 }
 0x229   :  { %v196_v54 = vpop.xlane.xlu1 %195 }
 0x22a   :  { %435 = vrsqrt.f32 %v199_v53  ;;  %v198_v55 = vmul.f32 0.03125, %v196_v54 }
 0x22c   :  { %v200_v56 = vadd.f32 1e-05, %v198_v55 }
 0x22e   :  { %437 = vrsqrt.f32 %v200_v56 }
 0x237   :  { %v436_v57 = vpop.eup %435 }
 0x238   :  { %v203_v58 = vmul.f32 %v436_v57, %v182_v31 }
 0x23a   :  { %426 = vmatprep.mubr.f32.mxu1 %v203_v58 }
 0x23b   :  { %v438_v59 = vpop.eup %437 }
 0x23c   :  { %v204_v60 = vmul.f32 %v438_v59, %v183_v36 }
 0x23e   :  { %427 = vmatmul.mubr.f32.vlgmr.msra.gmra.mxu1 %v204_v60 }
 0x2fe   :  { %v428_v62 = vpop.f32.mrf.mxu1 }
 0x2ff   :  { %v298_v63 = vadd.f32 %v428_v62, %v322_v61 }
 0x300   :  { %v292_v0 = vpop.f32.mrf.mxu1 }
 0x301   :  { %302 = vst [vmem:[#allocation9 + $0x8] sm:$0xff] %v298_v63  ;;  %v293_v1 = vadd.f32 %v322_v61, %v292_v0 }
 0x303   :  { %301 = vst [vmem:[#allocation9] sm:$0xff] %v293_v1 }
 0x304   :  { %510 = shalt.err (!%p507_p5)
}
 0x305   :  { %314 = dma.vmem_to_hbm [thread:$0]  %s309_s8, 256, %s590_s4, [#allocation5], %s527_s20, %s527_s20, %s528_s21  }
 0x306   :  { %523 = dma.done.wait [#allocation5], 256  }
 0x307   :  { %524 = vsyncadd [#allocation5], 4294967040 }
 0x308   :  { %318 = vsyncpa [#allocation4], 1 }
 0x309   :  { %319 = vsyncpa [#allocation7], 1 }
 0x30a   :  { %320 = vsyncpa [#allocation5], 1 }

</bundles_post_ra>
